<compile_context>
chip_gen: v5e
topology: v5e:2x2
jax: 0.10.0
libtpu: 0.0.40
codegen_flags: <defaults>
</compile_context>

<pallas_src>
import jax
import jax.numpy as jnp
from jax.experimental import pallas as pl
from jax.experimental.pallas import tpu as pltpu


# ----------------------------------------------------------------------------
# Kernels
# ----------------------------------------------------------------------------
def _head_kernel_kloop(x_ref, w_ref, b_ref, o_ref, acc_ref):
    # x_ref : (TB, TK)  tile of source embeddings
    # w_ref : (TK, TN)  tile of the projection weight
    # b_ref : (1,  TN)  bias row tile (f32)
    # o_ref : (TB, TN)  output tile
    # acc_ref:(TB, TN)  f32 accumulator, resident across the K axis
    k = pl.program_id(2)
    partial = jnp.dot(x_ref[...], w_ref[...],
                      preferred_element_type=jnp.float32)

    @pl.when(k == 0)
    def _init():
        # Fold the bias into the first K step; no separate zero-fill pass.
        acc_ref[...] = partial + b_ref[...]

    @pl.when(k > 0)
    def _accum():
        acc_ref[...] += partial

    @pl.when(k == pl.num_programs(2) - 1)
    def _finalize():
        o_ref[...] = acc_ref[...].astype(o_ref.dtype)


def _head_kernel_single(x_ref, w_ref, b_ref, o_ref):
    # Single-K-strip variant: no accumulator scratch, no pl.when.
    o_ref[...] = (jnp.dot(x_ref[...], w_ref[...],
                          preferred_element_type=jnp.float32)
                  + b_ref[...]).astype(o_ref.dtype)


# ----------------------------------------------------------------------------
# Helpers
# ----------------------------------------------------------------------------
def _round_up(x: int, m: int) -> int:
    return ((x + m - 1) // m) * m


def _vmem_capacity_bytes() -> int:
    try:
        return int(pltpu.get_tpu_info().vmem_capacity_bytes)
    except Exception:
        return 64 << 20   # conservative (v7x per-TC)


def _tile_candidates(dim: int, sizes, align: int):
    cands = []
    for s in sizes:
        t = dim if dim <= s else s     # full dim (no padding) or aligned tile
        if t not in cands:
            cands.append(t)
    return cands


def _choose_tiles(B, K, N, xb, wb, ob, budget, sub_align):
    """Pick (tb, tn, tk) minimizing a simple HBM + step-overhead cost model,
    subject to a double-buffered VMEM budget."""
    tb_c = _tile_candidates(B, [64, 128, 256, 512, 1024], sub_align)
    tn_c = _tile_candidates(N, [128, 256, 512, 1024], 128)
    tk_c = _tile_candidates(K, [128, 256, 512, 1024, 2048, 4096, 8192], 128)
    if K not in tk_c:                       # always consider collapsing K
        tk_c.append(K)

    best = None
    for tk in tk_c:
        Kp = _round_up(K, tk)
        nk = Kp // tk
        for tn in tn_c:
            Np = _round_up(N, tn)
            nn = Np // tn
            for tb in tb_c:
                Bp = _round_up(B, tb)
                nb = Bp // tb
                need = (2 * tb * tk * xb + 2 * tk * tn * wb
                        + 2 * tn * 4 + 2 * tb * tn * ob)
                if nk > 1:
                    need += tb * tn * 4     # f32 accumulator
                if need > budget:
                    continue
                steps = nb * nn * nk
                hbm = (nn * Bp * Kp * xb          # x re-read per N block
                       + nb * Kp * Np * wb        # W re-read per M block
                       + Np * 4 + Bp * Np * ob)
                mem_t = hbm / 8.0e11              # ~800 GB/s floor
                comp_t = (2.0 * Bp * Kp * Np) / 2.0e14
                comp_t /= min(nb * nn, 2)         # 2 TCs need >=2 parallel blocks
                cost = max(mem_t, comp_t) + steps * 3.5e-7
                if best is None or cost < best[0]:
                    best = (cost, tb, tn, tk)
    if best is None:                               # minimal legal fallback
        tb = B if B <= sub_align else sub_align
        tn = N if N <= 128 else 128
        tk = K if K <= 128 else 128
        return tb, tn, tk
    return best[1], best[2], best[3]


# ----------------------------------------------------------------------------
# Concrete ETP transfusion head (prepare-once, call-many)
# ----------------------------------------------------------------------------
class ETPTransfusionHeadLinear:
    """Concrete ETPTransfusionHead: y = source_embedding @ W + b (Pallas GEMM).

    Weight cast/pad is done once at construction (hoisted out of the hot
    path); per call only the activation is cast/padded.
    """

    def __init__(self, weight: jax.Array, bias: jax.Array, *,
                 compute_dtype=jnp.bfloat16, batch_hint: int = 256,
                 tile_override=None):
        K, N = weight.shape
        assert bias.shape == (N,), "bias must be (wubu_tangent_dim,)"
        self.source_embedding_dim = K
        self.wubu_tangent_dim = N
        self.compute_dtype = (None if compute_dtype is None
                              else jnp.dtype(compute_dtype))

        w = weight if self.compute_dtype is None else weight.astype(
            self.compute_dtype)
        b = bias.astype(jnp.float32).reshape(1, N)

        xb = jnp.dtype(self.compute_dtype or weight.dtype).itemsize
        wb = jnp.dtype(w.dtype).itemsize
        ob = 4                                     # assume f32-ish output
        self._sub_align = max(8, 32 // min(xb, ob))

        vmem_cap = _vmem_capacity_bytes()
        self._vmem_cap = vmem_cap
        budget = min(vmem_cap * 3 // 4, vmem_cap - (8 << 20))

        if tile_override is not None:
            tb_t, tn_t, tk_t = tile_override
            tb_t = _round_up(tb_t, self._sub_align)
            tn = N if N <= tn_t else _round_up(tn_t, 128)
            tk = K if K <= tk_t else _round_up(tk_t, 128)
        else:
            tb_t, tn, tk = _choose_tiles(batch_hint, K, N, xb, wb, ob,
                                         budget, self._sub_align)
        self._tb_target, self._tn, self._tk = tb_t, tn, tk

        Kp = _round_up(K, tk)
        Np = _round_up(N, tn)
        if (Kp, Np) != (K, N):
            w = jnp.pad(w, ((0, Kp - K), (0, Np - N)))
        if Np != N:
            b = jnp.pad(b, ((0, 0), (0, Np - N)))
        self._w, self._b = w, b
        self._Kp, self._Np = Kp, Np

    def __call__(self, source_embedding: jax.Array) -> jax.Array:
        B, K = source_embedding.shape
        assert K == self.source_embedding_dim, \
            "source_embedding last dim must equal source_embedding_dim"
        N = self.wubu_tangent_dim
        out_dtype = source_embedding.dtype

        x = source_embedding
        if self.compute_dtype is not None and x.dtype != self.compute_dtype:
            x = x.astype(self.compute_dtype)

        tn, tk = self._tn, self._tk
        Kp, Np = self._Kp, self._Np
        tb = B if B <= self._tb_target else self._tb_target
        Bp = _round_up(B, tb)
        if (Bp, Kp) != (B, K):
            x = jnp.pad(x, ((0, Bp - B), (0, Kp - K)))

        nb, nn, nk = Bp // tb, Np // tn, Kp // tk

        xb = jnp.dtype(x.dtype).itemsize
        wb = jnp.dtype(self._w.dtype).itemsize
        ob = jnp.dtype(out_dtype).itemsize
        need = (2 * tb * tk * xb + 2 * tk * tn * wb + 2 * tn * 4
                + 2 * tb * tn * ob + (tb * tn * 4 if nk > 1 else 0))
        vmem_limit = int(min(max(need * 3 // 2 + (2 << 20), 16 << 20),
                             max(self._vmem_cap - (8 << 20), 16 << 20)))

        cost = pl.CostEstimate(
            flops=2 * Bp * Kp * Np,
            transcendentals=0,
            bytes_accessed=(nn * Bp * Kp * xb + nb * Kp * Np * wb
                            + Np * 4 + Bp * Np * ob))

        if nk == 1:
            grid = (nb, nn)
            kernel = _head_kernel_single
            in_specs = [
                pl.BlockSpec((tb, tk), lambda i, j: (i, 0)),   # x
                pl.BlockSpec((tk, tn), lambda i, j: (0, j)),   # W
                pl.BlockSpec((1, tn), lambda i, j: (0, j)),    # bias
            ]
            out_spec = pl.BlockSpec((tb, tn), lambda i, j: (i, j))
            scratch = ()
            dims = ("parallel", "parallel")
        else:
            grid = (nb, nn, nk)
            kernel = _head_kernel_kloop
            in_specs = [
                pl.BlockSpec((tb, tk), lambda i, j, k: (i, k)),   # x
                pl.BlockSpec((tk, tn), lambda i, j, k: (k, j)),   # W
                pl.BlockSpec((1, tn), lambda i, j, k: (0, j)),    # bias
            ]
            out_spec = pl.BlockSpec((tb, tn), lambda i, j, k: (i, j))
            scratch = (pltpu.VMEM((tb, tn), jnp.float32),)
            dims = ("parallel", "parallel", "arbitrary")

        out = pl.pallas_call(
            kernel,
            out_shape=jax.ShapeDtypeStruct((Bp, Np), out_dtype),
            grid_spec=pltpu.PrefetchScalarGridSpec(
                num_scalar_prefetch=0,
                grid=grid,
                in_specs=in_specs,
                out_specs=out_spec,
                scratch_shapes=scratch),
            compiler_params=pltpu.CompilerParams(
                dimension_semantics=dims,
                vmem_limit_bytes=vmem_limit),
            cost_estimate=cost,
        )(x, self._w, self._b)

        if (Bp, Np) != (B, N):
            out = out[:B, :N]
        return out


def etp_transfusion_head(source_embedding, weight, bias, **kwargs):
    """One-shot functional convenience wrapper (prepares params per call)."""
    return ETPTransfusionHeadLinear(weight, bias, **kwargs)(source_embedding)


# ----------------------------------------------------------------------------
# Self-test
# ----------------------------------------------------------------------------
if __name__ == "__main__":
    # ---- shapes consistent with the module's constructor ----
    batch = 8
    source_embedding_dim = 32
    wubu_tangent_dim = 32

    key = jax.random.PRNGKey(0)
    kx, kw, kb = jax.random.split(key, 3)

    source_embedding = jax.random.normal(
        kx, (batch, source_embedding_dim), dtype=jnp.float32)

    # Deterministic parameter init (Kaiming-uniform-style scaling).
    fan_in = source_embedding_dim
    bound = 1.0 / (fan_in ** 0.5)
    weight = jax.random.uniform(
        kw, (source_embedding_dim, wubu_tangent_dim),
        minval=-bound, maxval=bound, dtype=jnp.float32)
    bias = jax.random.uniform(
        kb, (wubu_tangent_dim,), minval=-bound, maxval=bound,
        dtype=jnp.float32)

    ref = source_embedding @ weight + bias

    # ---- Test 1: exact f32 compute path (compute_dtype=None) ----
    head_f32 = ETPTransfusionHeadLinear(weight, bias, compute_dtype=None)
    out1 = jax.block_until_ready(head_f32(source_embedding))
    assert out1.shape == (batch, wubu_tangent_dim)
    assert jnp.allclose(out1, ref, atol=1e-5, rtol=1e-5), "f32 path mismatch"

    # ---- Test 2: default bf16 compute path (f32 accumulation) ----
    head_bf16 = ETPTransfusionHeadLinear(weight, bias)   # bf16 default
    out2 = jax.block_until_ready(head_bf16(source_embedding))
    assert out2.dtype == jnp.float32
    assert jnp.allclose(out2, ref, atol=1e-1, rtol=1e-1), "bf16 path mismatch"

    # ---- Test 3: ragged shapes + forced tiles exercising padding and the
    #      full (M, N, K) grid with the K-loop accumulator kernel ----
    b3, ds3, dt3 = 20, 384, 256
    k1, k2, k3 = jax.random.split(jax.random.PRNGKey(1), 3)
    x3 = jax.random.normal(k1, (b3, ds3), dtype=jnp.float32)
    w3 = jax.random.normal(k2, (ds3, dt3), dtype=jnp.float32) * 0.05
    bb3 = jax.random.normal(k3, (dt3,), dtype=jnp.float32) * 0.05
    out3 = jax.block_until_ready(
        etp_transfusion_head(x3, w3, bb3, compute_dtype=None,
                             tile_override=(16, 128, 128)))
    ref3 = x3 @ w3 + bb3
    assert out3.shape == (b3, dt3)
    assert jnp.allclose(out3, ref3, atol=1e-4, rtol=1e-4), "ragged mismatch"

    # ---- Test 4: auto tile selection on a slightly larger bf16 problem ----
    b4, ds4, dt4 = 16, 256, 384
    k1, k2, k3 = jax.random.split(jax.random.PRNGKey(2), 3)
    x4 = jax.random.normal(k1, (b4, ds4), dtype=jnp.float32)
    w4 = jax.random.normal(k2, (ds4, dt4), dtype=jnp.float32) * 0.05
    bb4 = jax.random.normal(k3, (dt4,), dtype=jnp.float32) * 0.05
    out4 = jax.block_until_ready(etp_transfusion_head(x4, w4, bb4))
    ref4 = x4 @ w4 + bb4
    assert out4.shape == (b4, dt4)
    assert jnp.allclose(out4, ref4, atol=1e-1, rtol=1e-1), "auto-tile mismatch"

    print("KERNEL_OK")
</pallas_src>

<mosaic_0001>
module attributes {stable_mosaic.version = 11 : i64} {
  func.func @_head_kernel_single(%arg0: i32, %arg1: i32, %arg2: memref<8x32xf32, #tpu.memory_space<vmem>>, %arg3: memref<32x32xf32, #tpu.memory_space<vmem>>, %arg4: memref<1x32xf32, #tpu.memory_space<vmem>>, %arg5: memref<8x32xf32, #tpu.memory_space<vmem>>) attributes {dimension_semantics = [#tpu.dimension_semantics<parallel>, #tpu.dimension_semantics<parallel>], iteration_bounds = array<i64: 1, 1>, scalar_prefetch = 0 : i64, scratch_operands = 0 : i64, tpu.core_type = #tpu.core_type<tc>, window_params = [{transform_indices = @transform_0, window_bounds = array<i64: 8, 32>}, {transform_indices = @transform_1, window_bounds = array<i64: 32, 32>}, {transform_indices = @transform_2, window_bounds = array<i64: 1, 32>}, {transform_indices = @transform_3, window_bounds = array<i64: 8, 32>}]} {
    %c0 = arith.constant 0 : index
    %c0_0 = arith.constant 0 : index
    %0 = vector.load %arg2[%c0, %c0_0] : memref<8x32xf32, #tpu.memory_space<vmem>>, vector<8x32xf32>
    %c0_1 = arith.constant 0 : index
    %c0_2 = arith.constant 0 : index
    %1 = vector.load %arg3[%c0_1, %c0_2] : memref<32x32xf32, #tpu.memory_space<vmem>>, vector<32x32xf32>
    %cst = arith.constant dense<0.000000e+00> : vector<8x32xf32>
    %2 = tpu.matmul %0, %1, %cst {dimension_numbers = #tpu.dot_dimension_numbers<[1], [0], [0], [1], [0, 0, 1, 1], [], []>} : vector<8x32xf32>, vector<32x32xf32>, vector<8x32xf32> -> vector<8x32xf32>
    %c0_3 = arith.constant 0 : index
    %c0_4 = arith.constant 0 : index
    %3 = vector.load %arg4[%c0_3, %c0_4] : memref<1x32xf32, #tpu.memory_space<vmem>>, vector<1x32xf32>
    %4 = vector.broadcast %3 : vector<1x32xf32> to vector<8x32xf32>
    %5 = arith.addf %2, %4 : vector<8x32xf32>
    %c0_5 = arith.constant 0 : index
    %c0_6 = arith.constant 0 : index
    %6 = vector.load %arg5[%c0_5, %c0_6] : memref<8x32xf32, #tpu.memory_space<vmem>>, vector<8x32xf32>
    tpu.vector_store %arg5[%c0_5, %c0_6], %5 {strides = array<i32>} : memref<8x32xf32, #tpu.memory_space<vmem>>, vector<8x32xf32>,
    return
  }
  func.func @transform_0(%arg0: i32, %arg1: i32) -> (i32, i32) {
    %c0_i32 = arith.constant 0 : i32
    %c0_i32_0 = arith.constant 0 : i32
    return %arg0, %c0_i32 : i32, i32
  }
  func.func @transform_1(%arg0: i32, %arg1: i32) -> (i32, i32) {
    %c0_i32 = arith.constant 0 : i32
    %c0_i32_0 = arith.constant 0 : i32
    return %c0_i32, %arg1 : i32, i32
  }
  func.func @transform_2(%arg0: i32, %arg1: i32) -> (i32, i32) {
    %c0_i32 = arith.constant 0 : i32
    %c0_i32_0 = arith.constant 0 : i32
    return %c0_i32, %arg1 : i32, i32
  }
  func.func @transform_3(%arg0: i32, %arg1: i32) -> (i32, i32) {
    %c0_i32 = arith.constant 0 : i32
    return %arg0, %arg1 : i32, i32
  }
}

</mosaic_0001>

<bundles_post_ra>
// kernel: tpu_custom_call.1
= control target key start
LH: loop header
LB: loop body
LE: loop exit
PB: predicated region body
PF: predicated region fallthrough
CT: control target
= control target key end

     0   :  { %8 = vsyncpa [#allocation3], 0  ;;  %s219_s0 = inlined_call_operand.hbm [shape: f32[8,32], index: 0, kind: input, shape index: {}]   ;;  %s220_s1 = inlined_call_operand.hbm [shape: f32[32,32], index: 1, kind: input, shape index: {}]   ;;  %s221_s2 = inlined_call_operand.vmem [shape: f32[1,32], index: 2, kind: input, shape index: {}]   ;;  %s222_s3 = inlined_call_operand.hbm [shape: f32[8,32], index: 3, kind: output, shape index: {}]  }
   0x1   :  { %9 = vsyncpa [#allocation6], 0 }
   0x2   :  { %10 = vsyncpa [#allocation4], 0  ;;  %s16_s14 = sshll.u32 %s219_s0, 4  ;;  %s182_s15 = smov [#allocation2]   ;;  %s17_s14 = int_to_ptr.hbm [resolvable:$true] %s16_s14 }
   0x3   :  { %s18_s16 = sshll.u32 %s182_s15, 4  ;;  %s26_s19 = sshll.u32 %s220_s1, 4  ;;  %s19_s16 = int_to_ptr.vmem [resolvable:$true] %s18_s16  ;;  %s27_s19 = int_to_ptr.hbm [resolvable:$true] %s26_s19 }
   0x4   :  { %21 = dma.hbm_to_vmem [thread:$0]  %s17_s14, 128, %s19_s16, [#allocation3]  }
   0x5   :  { %s183_s20 = smov [#allocation5]   ;;  %s184_s22 = smov 128  }
   0x6   :  { %s28_s21 = sshll.u32 %s183_s20, 4  ;;  %s185_s23 = smov 8   ;;  %s29_s21 = int_to_ptr.vmem [resolvable:$true] %s28_s21 }
   0x7   :  { %34 = dma.hbm_to_vmem [thread:$0]  %s27_s19, 512, %s29_s21, [#allocation6], %s184_s22, %s184_s22, %s185_s23  }
   0x8   :  { %176 = dma.done.wait [#allocation3], 128  }
   0x9   :  { %177 = vsyncadd [#allocation3], 4294967168 }
   0xa   :  { %178 = dma.done.wait [#allocation6], 512  }
   0xb   :  { %179 = vsyncadd [#allocation6], 4294966784  ;;  %v49_v0 = vld [vmem:[#allocation5 + $0x18] sm:$0xff]  ;;  %v48_v1 = vld [vmem:[#allocation5 + $0x10] sm:$0xff]  ;;  %vm54_vm0 = vcmask 261120   ;;  %s186_s24 = smov [#allocation7]  }
   0xc   :  { %70 = vmatpush.msra.mxu0 %v49_v0  ;;  %v47_v2 = vld [vmem:[#allocation5 + $0x8] sm:$0xff]  ;;  %v46_v3 = vld [vmem:[#allocation5] sm:$0xff]  ;;  %v45_v4 = vld [vmem:[#allocation2] sm:$0xff]  ;;  %s84_s25 = sshll.u32 %s186_s24, 4  ;;  %s86_s28 = sshll.u32 %s222_s3, 4  ;;  %s85_s25 = int_to_ptr.vmem [resolvable:$true] %s84_s25  ;;  %s87_s28 = int_to_ptr.hbm [resolvable:$true] %s86_s28 }
   0xd   :  { %v103_v5 = vld [vmem:[%s221_s2] ss:$0 sm:$0xff] }
   0xe   :  { %71 = vmatpush.msra.mxu0 %v48_v1 }
  0x10   :  { %72 = vmatpush.msra.mxu0 %v47_v2 }
  0x12   :  { %73 = vmatpush.msra.mxu0 %v46_v3 }
  0x13   :  { %97 = vmatmul.msk.f32.vlgmr.msra.gmra.mxu0 %vm54_vm0, %v45_v4 }
  0x90   :  { %v75_v6 = vpop.f32.mrf.mxu0 }
  0x91   :  { %v76_v7 = vadd.f32 %v103_v5, %v75_v6 }
  0x93   :  { %78 = vst.msk [vmem:[#allocation7] sm:$0xff] %vm54_vm0, %v76_v7 }
  0x94   :  { %89 = dma.vmem_to_hbm [thread:$0]  %s85_s25, 128, %s87_s28, [#allocation4]  }
  0x95   :  { %180 = dma.done.wait [#allocation4], 128  }
  0x96   :  { %181 = vsyncadd [#allocation4], 4294967168 }
  0x97   :  { %94 = vsyncpa [#allocation3], 1 }
  0x98   :  { %95 = vsyncpa [#allocation6], 1 }
  0x99   :  { %96 = vsyncpa [#allocation4], 1 }

</bundles_post_ra>
